<compile_context>
chip_gen: v7x
topology: tpu7x:2x2x1
jax: 0.10.0
libtpu: 0.0.40
codegen_flags: <defaults>
</compile_context>

<pallas_src>
import jax
import jax.numpy as jnp
from jax.experimental import pallas as pl
from jax.experimental.pallas import tpu as pltpu


def _round_up(x, m):
    return (x + m - 1) // m * m


def _vit_head_kernel(x_ref, w1_ref, b1_ref, w2_ref, b2_ref, o_ref):
    # x_ref: (bb, in_p) bf16 CLS rows.  All dims lane/sublane padded.
    x = x_ref[...]

    # linear_1 (bf16 in, f32 accumulation on the MXU) + bias + tanh in f32.
    h = jnp.dot(x, w1_ref[...], preferred_element_type=jnp.float32)
    h = jnp.tanh(h + b1_ref[...])             # (bb, inter_p) f32, EUP tanh

    # linear_2: downcast to bf16 only right before the second MXU pass.
    y = jnp.dot(h.astype(w2_ref.dtype), w2_ref[...],
                preferred_element_type=jnp.float32)
    y = y + b2_ref[...]                       # (bb, out_p) + (1, out_p)
    o_ref[...] = y.astype(o_ref.dtype)


def vanilla_vit_head(x, w1, b1, w2, b2, *, max_block_b=128):
    """x: (B, S, in_f); w1: (in_f, inter); b1: (inter,); w2: (inter, out); b2: (out,)."""
    B, S, in_f = x.shape
    inter = w1.shape[1]
    out_f = w2.shape[1]
    out_dtype = x.dtype
    itemsize_out = jnp.dtype(out_dtype).itemsize

    # ---- padding / tiling decisions -------------------------------------
    in_p = _round_up(in_f, 128)
    inter_p = _round_up(inter, 128)
    out_p = _round_up(out_f, 128)
    bb = min(max_block_b, _round_up(B, 8))        # batch tile (sublane aligned)
    B_p = _round_up(B, bb)
    grid = (B_p // bb,)

    # ---- parameter prep (bf16 weights, zero-padded) ----------------------
    w1_bf = jnp.pad(w1.astype(jnp.bfloat16),
                    ((0, in_p - in_f), (0, inter_p - inter)))
    w2_bf = jnp.pad(w2.astype(jnp.bfloat16),
                    ((0, inter_p - inter), (0, out_p - out_f)))
    b1_2d = jnp.pad(b1.astype(jnp.float32), (0, inter_p - inter)).reshape(1, inter_p)
    b2_2d = jnp.pad(b2.astype(jnp.float32), (0, out_p - out_f)).reshape(1, out_p)

    # ---- activation prep: CLS slice in the wrapper, bf16, padded ---------
    cls = x[:, 0, :].astype(jnp.bfloat16)                       # (B, in_f)
    cls = jnp.pad(cls, ((0, B_p - B), (0, in_p - in_f)))        # (B_p, in_p)

    # ---- VMEM budget (double-buffered tiles + resident weights) ----------
    vmem_need = (2 * bb * in_p * 2              # x tiles (bf16)
                 + in_p * inter_p * 2           # w1 (bf16, resident)
                 + inter_p * out_p * 2          # w2 (bf16, resident)
                 + (inter_p + out_p) * 4        # biases (f32)
                 + 2 * bb * out_p * itemsize_out  # output tiles
                 + bb * (inter_p + out_p) * 4)  # f32 temporaries
    vmem_limit = int(min(max(2 * vmem_need, 16 * 1024 * 1024), 64 * 1024 * 1024))

    cost = pl.CostEstimate(
        flops=2 * B_p * in_p * inter_p + 2 * B_p * inter_p * out_p,
        transcendentals=B_p * inter_p,
        bytes_accessed=(B_p * in_p * 2
                        + in_p * inter_p * 2
                        + inter_p * out_p * 2
                        + inter_p * 4 + out_p * 4
                        + B_p * out_p * itemsize_out),
    )

    out_padded = pl.pallas_call(
        _vit_head_kernel,
        out_shape=jax.ShapeDtypeStruct((B_p, out_p), out_dtype),
        grid_spec=pl.GridSpec(
            grid=grid,
            in_specs=[
                # CLS rows: batch tiled by bb, full (padded) feature dim.
                pl.BlockSpec((bb, in_p), lambda i: (i, 0)),
                # Weights / biases are grid-invariant (same block every step).
                pl.BlockSpec((in_p, inter_p), lambda i: (0, 0)),
                pl.BlockSpec((1, inter_p), lambda i: (0, 0)),
                pl.BlockSpec((inter_p, out_p), lambda i: (0, 0)),
                pl.BlockSpec((1, out_p), lambda i: (0, 0)),
            ],
            out_specs=pl.BlockSpec((bb, out_p), lambda i: (i, 0)),
        ),
        compiler_params=pltpu.CompilerParams(
            dimension_semantics=("parallel",),
            vmem_limit_bytes=vmem_limit),
        cost_estimate=cost,
    )(cls, w1_bf, b1_2d, w2_bf, b2_2d)

    # Strip batch / lane padding back to the module's output shape.
    return out_padded[:B, :out_f]


def vanilla_vit_head_ref(x, w1, b1, w2, b2):
    """Pure-f32 reference of the module semantics."""
    cls = x[:, 0, :]
    h = jnp.tanh(cls @ w1 + b1)
    return h @ w2 + b2


if __name__ == "__main__":
    # Small shapes consistent with the module: (batch, seq, hidden).
    B, S = 8, 8
    in_features, intermediate_features, out_features = 32, 64, 16

    key = jax.random.PRNGKey(0)
    kx, kw1, kb1, kw2, kb2 = jax.random.split(key, 5)

    x = jax.random.normal(kx, (B, S, in_features), dtype=jnp.float32)

    # Deterministic parameter init (uniform, PyTorch-Linear-like scaling),
    # stored pre-transposed as (in, out).
    lim1 = 1.0 / jnp.sqrt(in_features)
    w1 = jax.random.uniform(kw1, (in_features, intermediate_features),
                            minval=-lim1, maxval=lim1, dtype=jnp.float32)
    b1 = jax.random.uniform(kb1, (intermediate_features,),
                            minval=-lim1, maxval=lim1, dtype=jnp.float32)
    lim2 = 1.0 / jnp.sqrt(intermediate_features)
    w2 = jax.random.uniform(kw2, (intermediate_features, out_features),
                            minval=-lim2, maxval=lim2, dtype=jnp.float32)
    b2 = jax.random.uniform(kb2, (out_features,),
                            minval=-lim2, maxval=lim2, dtype=jnp.float32)

    out = vanilla_vit_head(x, w1, b1, w2, b2)
    out = jax.block_until_ready(out)
    assert out.shape == (B, out_features), out.shape

    # bf16-matched reference (same quantization points as the kernel path).
    xq = x.astype(jnp.bfloat16).astype(jnp.float32)
    w1q = w1.astype(jnp.bfloat16).astype(jnp.float32)
    w2q = w2.astype(jnp.bfloat16).astype(jnp.float32)
    h = jnp.tanh(xq[:, 0, :] @ w1q + b1)
    ref_matched = h.astype(jnp.bfloat16).astype(jnp.float32) @ w2q + b2
    assert jnp.allclose(out, ref_matched, atol=2e-2, rtol=2e-2), \
        float(jnp.max(jnp.abs(out - ref_matched)))

    # Loose check against the pure-f32 module semantics (bf16 weight error).
    ref_f32 = vanilla_vit_head_ref(x, w1, b1, w2, b2)
    assert jnp.allclose(out, ref_f32, atol=1e-1, rtol=1e-1), \
        float(jnp.max(jnp.abs(out - ref_f32)))

    print("KERNEL_OK")
</pallas_src>

<mosaic_0001>
module attributes {stable_mosaic.version = 11 : i64} {
  func.func @_vit_head_kernel(%arg0: i32, %arg1: memref<8x128xbf16, #tpu.memory_space<vmem>>, %arg2: memref<128x128xbf16, #tpu.memory_space<vmem>>, %arg3: memref<1x128xf32, #tpu.memory_space<vmem>>, %arg4: memref<128x128xbf16, #tpu.memory_space<vmem>>, %arg5: memref<1x128xf32, #tpu.memory_space<vmem>>, %arg6: memref<8x128xf32, #tpu.memory_space<vmem>>) attributes {dimension_semantics = [#tpu.dimension_semantics<parallel>], iteration_bounds = array<i64: 1>, scalar_prefetch = 0 : i64, scratch_operands = 0 : i64, tpu.core_type = #tpu.core_type<tc>, window_params = [{transform_indices = @transform_0, window_bounds = array<i64: 8, 128>}, {pipeline_mode = #tpu.pipeline_mode<synchronous>, transform_indices = @transform_1, window_bounds = array<i64: 128, 128>}, {pipeline_mode = #tpu.pipeline_mode<synchronous>, transform_indices = @transform_2, window_bounds = array<i64: 1, 128>}, {pipeline_mode = #tpu.pipeline_mode<synchronous>, transform_indices = @transform_3, window_bounds = array<i64: 128, 128>}, {pipeline_mode = #tpu.pipeline_mode<synchronous>, transform_indices = @transform_4, window_bounds = array<i64: 1, 128>}, {transform_indices = @transform_5, window_bounds = array<i64: 8, 128>}]} {
    %c0 = arith.constant 0 : index
    %c0_0 = arith.constant 0 : index
    %0 = vector.load %arg1[%c0, %c0_0] : memref<8x128xbf16, #tpu.memory_space<vmem>>, vector<8x128xbf16>
    %c0_1 = arith.constant 0 : index
    %c0_2 = arith.constant 0 : index
    %1 = vector.load %arg2[%c0_1, %c0_2] : memref<128x128xbf16, #tpu.memory_space<vmem>>, vector<128x128xbf16>
    %cst = arith.constant dense<0.000000e+00> : vector<8x128xf32>
    %2 = tpu.matmul %0, %1, %cst {dimension_numbers = #tpu.dot_dimension_numbers<[1], [0], [0], [1], [0, 0, 1, 1], [], []>} : vector<8x128xbf16>, vector<128x128xbf16>, vector<8x128xf32> -> vector<8x128xf32>
    %c0_3 = arith.constant 0 : index
    %c0_4 = arith.constant 0 : index
    %3 = vector.load %arg3[%c0_3, %c0_4] : memref<1x128xf32, #tpu.memory_space<vmem>>, vector<1x128xf32>
    %4 = vector.broadcast %3 : vector<1x128xf32> to vector<8x128xf32>
    %5 = arith.addf %2, %4 : vector<8x128xf32>
    %6 = math.tanh %5 : vector<8x128xf32>
    %7 = arith.truncf %6 : vector<8x128xf32> to vector<8x128xbf16>
    %c0_5 = arith.constant 0 : index
    %c0_6 = arith.constant 0 : index
    %8 = vector.load %arg4[%c0_5, %c0_6] : memref<128x128xbf16, #tpu.memory_space<vmem>>, vector<128x128xbf16>
    %cst_7 = arith.constant dense<0.000000e+00> : vector<8x128xf32>
    %9 = tpu.matmul %7, %8, %cst_7 {dimension_numbers = #tpu.dot_dimension_numbers<[1], [0], [0], [1], [0, 0, 1, 1], [], []>} : vector<8x128xbf16>, vector<128x128xbf16>, vector<8x128xf32> -> vector<8x128xf32>
    %c0_8 = arith.constant 0 : index
    %c0_9 = arith.constant 0 : index
    %10 = vector.load %arg5[%c0_8, %c0_9] : memref<1x128xf32, #tpu.memory_space<vmem>>, vector<1x128xf32>
    %11 = vector.broadcast %10 : vector<1x128xf32> to vector<8x128xf32>
    %12 = arith.addf %9, %11 : vector<8x128xf32>
    %c0_10 = arith.constant 0 : index
    %c0_11 = arith.constant 0 : index
    %13 = vector.load %arg6[%c0_10, %c0_11] : memref<8x128xf32, #tpu.memory_space<vmem>>, vector<8x128xf32>
    tpu.vector_store %arg6[%c0_10, %c0_11], %12 {strides = array<i32>} : memref<8x128xf32, #tpu.memory_space<vmem>>, vector<8x128xf32>,
    return
  }
  func.func @transform_0(%arg0: i32) -> (i32, i32) {
    %c0_i32 = arith.constant 0 : i32
    %c0_i32_0 = arith.constant 0 : i32
    return %arg0, %c0_i32 : i32, i32
  }
  func.func @transform_1(%arg0: i32) -> (i32, i32) {
    %c0_i32 = arith.constant 0 : i32
    %c0_i32_0 = arith.constant 0 : i32
    %c0_i32_1 = arith.constant 0 : i32
    return %c0_i32, %c0_i32_0 : i32, i32
  }
  func.func @transform_2(%arg0: i32) -> (i32, i32) {
    %c0_i32 = arith.constant 0 : i32
    %c0_i32_0 = arith.constant 0 : i32
    %c0_i32_1 = arith.constant 0 : i32
    return %c0_i32, %c0_i32_0 : i32, i32
  }
  func.func @transform_3(%arg0: i32) -> (i32, i32) {
    %c0_i32 = arith.constant 0 : i32
    %c0_i32_0 = arith.constant 0 : i32
    %c0_i32_1 = arith.constant 0 : i32
    return %c0_i32, %c0_i32_0 : i32, i32
  }
  func.func @transform_4(%arg0: i32) -> (i32, i32) {
    %c0_i32 = arith.constant 0 : i32
    %c0_i32_0 = arith.constant 0 : i32
    %c0_i32_1 = arith.constant 0 : i32
    return %c0_i32, %c0_i32_0 : i32, i32
  }
  func.func @transform_5(%arg0: i32) -> (i32, i32) {
    %c0_i32 = arith.constant 0 : i32
    %c0_i32_0 = arith.constant 0 : i32
    return %arg0, %c0_i32 : i32, i32
  }
}

</mosaic_0001>

<bundles_post_ra>
// kernel: tpu_custom_call.1
= control target key start
LH: loop header
LB: loop body
LE: loop exit
PB: predicated region body
PF: predicated region fallthrough
CT: control target
= control target key end

     0   :  { %10 = vsyncpa [#allocation3], 0  ;;  %s597_s0 = inlined_call_operand.hbm [shape: bf16[8,128], index: 0, kind: input, shape index: {}]   ;;  %s598_s1 = inlined_call_operand.hbm [shape: bf16[128,128], index: 1, kind: input, shape index: {}]   ;;  %s599_s2 = inlined_call_operand.vmem [shape: f32[1,128], index: 2, kind: input, shape index: {}]   ;;  %s600_s3 = inlined_call_operand.hbm [shape: bf16[128,128], index: 3, kind: input, shape index: {}]   ;;  %s601_s4 = inlined_call_operand.vmem [shape: f32[1,128], index: 4, kind: input, shape index: {}]   ;;  %s602_s5 = inlined_call_operand.hbm [shape: f32[8,128], index: 5, kind: output, shape index: {}]  }
   0x1   :  { %11 = vsyncpa [#allocation6], 0 }
   0x2   :  { %12 = vsyncpa [#allocation4], 0  ;;  %s499_s18 = smov [#allocation5]   ;;  %s405_s22 = scalar_lea.hbm %s598_s1, 1024 }
   0x3   :  { %s28_s19 = sshll.u32 %s499_s18, 4  ;;  %p406_p0 = scmp.ne.s32.totalorder %s598_s1, %s405_s22  ;;  %s29_s19 = int_to_ptr.vmem [resolvable:$true] %s28_s19 }
   0x4   :  { %p409_p1 = scmp.lt.u32.totalorder %s405_s22, %s598_s1 }
   0x6   :  { %p411_p2 = pnand %p409_p1, %p406_p0 }
   0x8   :  { %414 = shalt.err (!%p411_p2)
}
   0x9   :  { %s415_s27 = scalar_lea.vmem %s29_s19, 1024  ;;  %p420_p4 = scmp.lt.s32.totalorder %s29_s19, %s29_s19 }
   0xa   :  { %p416_p3 = scmp.ne.s32.totalorder %s29_s19, %s415_s27  ;;  %p421_p5 = scmp.lt.s32.totalorder %s415_s27, %s415_s27 }
   0xc   :  { %p422_p6 = por %p421_p5, %p420_p4 }
   0xe   :  { %p423_p7 = pnand %p422_p6, %p416_p3 }
  0x10   :  { %426 = shalt.err (!%p423_p7)
}
  0x11   :  { %s500_s28 = smov 64   ;;  %s501_s29 = smov 4  }
  0x12   :  { %34 = dma.hbm_to_vmem [thread:$0]  %s598_s1, 1024, %s29_s19, [#allocation6], %s500_s28, %s500_s28, %s501_s29  }
  0x13   :  { %s502_s7 = smov [#allocation2]   ;;  %s503_s9 = smov [#allocation7]  }
  0x14   :  { %s19_s8 = sshll.u32 %s502_s7, 4  ;;  %s42_s10 = sshll.u32 %s503_s9, 4  ;;  %s20_s8 = int_to_ptr.vmem [resolvable:$true] %s19_s8  ;;  %s43_s10 = int_to_ptr.vmem [resolvable:$true] %s42_s10 }
  0x15   :  { %s427_s13 = scalar_lea.hbm %s597_s0, 64 }
  0x16   :  { %p428_p8 = scmp.ne.s32.totalorder %s597_s0, %s427_s13  ;;  %p431_p9 = scmp.lt.u32.totalorder %s427_s13, %s597_s0 }
  0x18   :  { %p433_p10 = pnand %p431_p9, %p428_p8 }
  0x1a   :  { %436 = shalt.err (!%p433_p10)
}
  0x1b   :  { %s437_s1 = scalar_lea.vmem %s20_s8, 64  ;;  %p442_p12 = scmp.lt.s32.totalorder %s20_s8, %s20_s8 }
  0x1c   :  { %p438_p11 = scmp.ne.s32.totalorder %s20_s8, %s437_s1  ;;  %p443_p13 = scmp.lt.s32.totalorder %s437_s1, %s437_s1 }
  0x1e   :  { %p444_p0 = por %p443_p13, %p442_p12 }
  0x20   :  { %p445_p1 = pnand %p444_p0, %p438_p11 }
  0x22   :  { %448 = shalt.err (!%p445_p1)
}
  0x23   :  { %22 = dma.hbm_to_vmem [thread:$0]  %s597_s0, 64, %s20_s8, [#allocation3]  }
  0x24   :  { %s449_s22 = scalar_lea.hbm %s600_s3, 1024 }
  0x25   :  { %p450_p2 = scmp.ne.s32.totalorder %s600_s3, %s449_s22  ;;  %p453_p3 = scmp.lt.u32.totalorder %s449_s22, %s600_s3 }
  0x27   :  { %p455_p4 = pnand %p453_p3, %p450_p2 }
  0x29   :  { %458 = shalt.err (!%p455_p4)
}
  0x2a   :  { %s459_s27 = scalar_lea.vmem %s43_s10, 1024  ;;  %p464_p6 = scmp.lt.s32.totalorder %s43_s10, %s43_s10 }
  0x2b   :  { %p460_p5 = scmp.ne.s32.totalorder %s43_s10, %s459_s27  ;;  %p465_p7 = scmp.lt.s32.totalorder %s459_s27, %s459_s27 }
  0x2d   :  { %p466_p8 = por %p465_p7, %p464_p6 }
  0x2f   :  { %p467_p9 = pnand %p466_p8, %p460_p5 }
  0x31   :  { %470 = shalt.err (!%p467_p9)
}
  0x32   :  { %48 = dma.hbm_to_vmem [thread:$0]  %s600_s3, 1024, %s43_s10, [#allocation6], %s500_s28, %s500_s28, %s501_s29  }
  0x33   :  { %493 = dma.done.wait [#allocation3], 64  }
  0x34   :  { %494 = vsyncadd [#allocation3], 4294967232 }
  0x35   :  { %495 = dma.done.wait [#allocation6], 2048  }
  0x36   :  { %496 = vsyncadd [#allocation6], 4294965248  ;;  %v504_v0 = vmov 0.0   ;;  %vm505_vm0 = vmmov 0   ;;  %v387_v1 = vld [vmem:[#allocation5] sm:$0xff]   ;;  %v388_v2 = vld [vmem:[#allocation5 + $0x8] sm:$0xff]  }
  0x37   :  { %339 = vmatprep.subr.bf16.mxu0 %v504_v0  ;;  %355 = vmatprep.mubr.msk.bf16.mxu0 %vm505_vm0, %v504_v0  ;;  %v389_v3 = vld [vmem:[#allocation5 + $0x10] sm:$0xff]   ;;  %v395_v4 = vld [vmem:[#allocation7] sm:$0xff]   ;;  %v390_v5 = vld [vmem:[#allocation5 + $0x18] sm:$0xff]   ;;  %s506_s7 = smov [#allocation8]  }
  0x38   :  { %359 = vmatprep.subr.bf16.mxu1 %v504_v0  ;;  %375 = vmatprep.mubr.msk.bf16.mxu1 %vm505_vm0, %v504_v0  ;;  %v396_v6 = vld [vmem:[#allocation7 + $0x8] sm:$0xff]   ;;  %v391_v7 = vld [vmem:[#allocation5 + $0x20] sm:$0xff]   ;;  %v397_v8 = vld [vmem:[#allocation7 + $0x10] sm:$0xff]   ;;  %s293_s8 = sshll.u32 %s506_s7, 4  ;;  %s294_s8 = int_to_ptr.vmem [resolvable:$true] %s293_s8 }
  0x39   :  { %340 = vmatpush3.bf16.msra.mxu0 %v387_v1  ;;  %360 = vmatpush3.bf16.msra.mxu1 %v395_v4  ;;  %v392_v9 = vld [vmem:[#allocation5 + $0x28] sm:$0xff]   ;;  %v398_v10 = vld [vmem:[#allocation7 + $0x18] sm:$0xff]   ;;  %v393_v11 = vld [vmem:[#allocation5 + $0x30] sm:$0xff]   ;;  %p476_p11 = scmp.lt.s32.totalorder %s294_s8, %s294_s8 }
  0x3a   :  { %341 = vmatprep.subr.bf16.mxu0 %v504_v0  ;;  %361 = vmatprep.subr.bf16.mxu1 %v504_v0  ;;  %v394_v12 = vld [vmem:[#allocation5 + $0x38] sm:$0xff]   ;;  %v399_v14 = vld [vmem:[#allocation7 + $0x20] sm:$0xff]   ;;  %v400_v15 = vld [vmem:[#allocation7 + $0x28] sm:$0xff]  }
  0x3b   :  { %v61_v13 = vld [vmem:[#allocation2] sm:$0xf]  ;;  %v401_v16 = vld [vmem:[#allocation7 + $0x30] sm:$0xff]  }
  0x3c   :  { %v402_v17 = vld [vmem:[#allocation7 + $0x38] sm:$0xff]  }
  0x3d   :  { %342 = vmatpush3.bf16.msra.mxu0 %v388_v2  ;;  %362 = vmatpush3.bf16.msra.mxu1 %v396_v6  ;;  %v303_v18 = vld [vmem:[%s599_s2] ss:$0 sm:$0xff]  ;;  %s471_s2 = scalar_lea.vmem %s294_s8, 128 }
  0x3e   :  { %343 = vmatprep.subr.bf16.mxu0 %v504_v0  ;;  %363 = vmatprep.subr.bf16.mxu1 %v504_v0  ;;  %v312_v26 = vld [vmem:[%s601_s4] ss:$0 sm:$0xff]  ;;  %p472_p10 = scmp.ne.s32.totalorder %s294_s8, %s471_s2  ;;  %p477_p12 = scmp.lt.s32.totalorder %s471_s2, %s471_s2 }
  0x40   :  { %p478_p13 = por %p477_p12, %p476_p11 }
  0x41   :  { %344 = vmatpush3.bf16.msra.mxu0 %v389_v3  ;;  %364 = vmatpush3.bf16.msra.mxu1 %v397_v8 }
  0x42   :  { %345 = vmatprep.subr.bf16.mxu0 %v504_v0  ;;  %365 = vmatprep.subr.bf16.mxu1 %v504_v0  ;;  %p479_p0 = pnand %p478_p13, %p472_p10 }
  0x45   :  { %346 = vmatpush3.bf16.msra.mxu0 %v390_v5  ;;  %366 = vmatpush3.bf16.msra.mxu1 %v398_v10 }
  0x46   :  { %347 = vmatprep.subr.bf16.mxu0 %v504_v0  ;;  %367 = vmatprep.subr.bf16.mxu1 %v504_v0 }
  0x49   :  { %348 = vmatpush3.bf16.msra.mxu0 %v391_v7  ;;  %368 = vmatpush3.bf16.msra.mxu1 %v399_v14 }
  0x4a   :  { %349 = vmatprep.subr.bf16.mxu0 %v504_v0  ;;  %369 = vmatprep.subr.bf16.mxu1 %v504_v0 }
  0x4d   :  { %350 = vmatpush3.bf16.msra.mxu0 %v392_v9  ;;  %370 = vmatpush3.bf16.msra.mxu1 %v400_v15 }
  0x4e   :  { %351 = vmatprep.subr.bf16.mxu0 %v504_v0  ;;  %371 = vmatprep.subr.bf16.mxu1 %v504_v0 }
  0x51   :  { %352 = vmatpush3.bf16.msra.mxu0 %v393_v11  ;;  %372 = vmatpush3.bf16.msra.mxu1 %v401_v16 }
  0x52   :  { %353 = vmatprep.subr.bf16.mxu0 %v504_v0  ;;  %373 = vmatprep.subr.bf16.mxu1 %v504_v0 }
  0x55   :  { %354 = vmatpush3.bf16.msra.mxu0 %v394_v12  ;;  %374 = vmatpush3.bf16.msra.mxu1 %v402_v17 }
  0x58   :  { %356 = vmatmul.mubr.bf16.vlgmr.msra.gmra.mrb[0].mxu0 %v61_v13 }
 0x12b   :  { %v167_v19 = vpop.f32.mrb[0].mxu0 }
 0x12c   :  { %v168_v20 = vadd.f32 %v303_v18, %v167_v19  ;;  %v357_v21 = vpop.f32.mrb[1].mxu0 }
 0x12d   :  { %v170_v22 = vpop.f32.mrb[2].mxu0 }
 0x12e   :  { %403 = vtanh.f32 %v168_v20  ;;  %v358_v23 = vpop.f32.mrb[3].mxu0 }
 0x138   :  { %v404_v24 = vpop.eup %403 }
 0x139   :  { %v174_v25 = vpack.c.bf16 %v404_v24, %v404_v24 }
 0x13b   :  { %376 = vmatmul.mubr.bf16.vlgmr.msra.gmra.mrb[0].mxu1 %v174_v25 }
 0x20e   :  { %v280_v27 = vpop.f32.mrb[0].mxu1 }
 0x20f   :  { %v281_v28 = vadd.f32 %v312_v26, %v280_v27  ;;  %v377_v29 = vpop.f32.mrb[1].mxu1 }
 0x210   :  { %v283_v30 = vpop.f32.mrb[2].mxu1 }
 0x211   :  { %286 = vst [vmem:[#allocation8] sm:$0xff] %v281_v28  ;;  %v378_v31 = vpop.f32.mrb[3].mxu1 }
 0x212   :  { %482 = shalt.err (!%p479_p0)
}
 0x213   :  { %s483_s4 = scalar_lea.hbm %s602_s5, 128 }
 0x214   :  { %p484_p1 = scmp.ne.s32.totalorder %s602_s5, %s483_s4  ;;  %p487_p2 = scmp.lt.u32.totalorder %s483_s4, %s602_s5 }
 0x216   :  { %p489_p3 = pnand %p487_p2, %p484_p1 }
 0x218   :  { %492 = shalt.err (!%p489_p3)
}
 0x219   :  { %296 = dma.vmem_to_hbm [thread:$0]  %s294_s8, 128, %s602_s5, [#allocation4]  }
 0x21a   :  { %497 = dma.done.wait [#allocation4], 128  }
 0x21b   :  { %498 = vsyncadd [#allocation4], 4294967168 }
 0x21c   :  { %300 = vsyncpa [#allocation3], 1 }
 0x21d   :  { %301 = vsyncpa [#allocation6], 1 }
 0x21e   :  { %302 = vsyncpa [#allocation4], 1 }

</bundles_post_ra>
